<compile_context>
chip_gen: v7x
topology: tpu7x:2x2x1
jax: 0.10.0
libtpu: 0.0.40
codegen_flags: <defaults>
</compile_context>

<pallas_src>
import math
import functools

import jax
import jax.numpy as jnp
from jax.experimental import pallas as pl
from jax.experimental.pallas import tpu as pltpu


# ----------------------------------------------------------------------------
# Fused kernel: one grid point == one batch element, all heads processed here.
# ----------------------------------------------------------------------------
def _fused_attn_kernel(
    q_ref, k_ref, v_ref,
    wq_ref, bq_ref, wk_ref, bk_ref, wv_ref, bv_ref, wo_ref, bo_ref,
    o_ref,
    ctx_ref,                      # VMEM scratch (Nq, internal_dim) f32
    *, num_heads, head_dim, scale, mxu_dtype,
):
    def proj(x_ref, w_ref, b_ref):
        # bf16 (or f32) operands, f32 accumulation, f32 bias add.
        return (
            jnp.dot(x_ref[...], w_ref[...], preferred_element_type=jnp.float32)
            + b_ref[...]
        )

    # Projections: (N, E) @ (E, I) + (1, I)  -> f32, then cast for the MXU.
    qp = proj(q_ref, wq_ref, bq_ref).astype(mxu_dtype)   # (Nq, I)
    kp = proj(k_ref, wk_ref, bk_ref).astype(mxu_dtype)   # (Nk, I)
    vp = proj(v_ref, wv_ref, bv_ref).astype(mxu_dtype)   # (Nk, I)

    # Per-head attention; static lane slices keep everything lane-dense and
    # the context is written back into a lane-dense (Nq, I) scratch.
    for h in range(num_heads):
        lo, hi = h * head_dim, (h + 1) * head_dim
        qh = qp[:, lo:hi]                                # (Nq, Dh)
        kh = kp[:, lo:hi]                                # (Nk, Dh)
        vh = vp[:, lo:hi]                                # (Nk, Dh)

        # s = q @ k^T via NT contraction dims: no in-kernel transpose.
        s = jax.lax.dot_general(
            qh, kh, (((1,), (1,)), ((), ())),
            preferred_element_type=jnp.float32,
        ) * scale                                        # (Nq, Nk) f32

        # Numerically-stable softmax, all in f32 (v5e-safe).
        m = jnp.max(s, axis=-1, keepdims=True)
        e = jnp.exp(s - m)
        inv = pl.reciprocal(jnp.sum(e, axis=-1, keepdims=True), approx=True)
        p = (e * inv).astype(mxu_dtype)                  # (Nq, Nk)

        ctx_ref[:, lo:hi] = jnp.dot(
            p, vh, preferred_element_type=jnp.float32
        )                                                # (Nq, Dh) f32

    # Output projection: (Nq, I) @ (I, E) + (1, E), lane-dense store.
    out = (
        jnp.dot(
            ctx_ref[...].astype(mxu_dtype), wo_ref[...],
            preferred_element_type=jnp.float32,
        )
        + bo_ref[...]
    )
    o_ref[...] = out.astype(o_ref.dtype)


# ----------------------------------------------------------------------------
# Wrapper
# ----------------------------------------------------------------------------
def attention_forward(
    params, q, k, v, *, num_heads, internal_dim, embed_dims,
    mxu_dtype=jnp.bfloat16,
):
    """q: (B, Nq, E), k/v: (B, Nk, E) -> (B, Nq, E). Fused single pallas_call."""
    B, Nq, E = q.shape
    Nk = k.shape[1]
    assert E == embed_dims
    head_dim = internal_dim // num_heads
    scale = 1.0 / math.sqrt(head_dim)

    wq, bq = params["q_proj"]
    wk, bk = params["k_proj"]
    wv, bv = params["v_proj"]
    wo, bo = params["out_proj"]

    cast = lambda a: a.astype(mxu_dtype)                 # MXU operands
    bias = lambda b: b.reshape(1, -1).astype(jnp.float32)  # f32 bias rows

    kernel = functools.partial(
        _fused_attn_kernel,
        num_heads=num_heads,
        head_dim=head_dim,
        scale=scale,
        mxu_dtype=mxu_dtype,
    )

    rep2 = lambda shape: pl.BlockSpec(shape, lambda b: (0, 0))  # grid-invariant

    return pl.pallas_call(
        kernel,
        out_shape=jax.ShapeDtypeStruct((B, Nq, embed_dims), jnp.float32),
        grid_spec=pltpu.PrefetchScalarGridSpec(
            num_scalar_prefetch=0,
            grid=(B,),
            in_specs=[
                pl.BlockSpec((None, Nq, E), lambda b: (b, 0, 0)),   # q
                pl.BlockSpec((None, Nk, E), lambda b: (b, 0, 0)),   # k
                pl.BlockSpec((None, Nk, E), lambda b: (b, 0, 0)),   # v
                rep2((E, internal_dim)),                            # Wq
                rep2((1, internal_dim)),                            # bq
                rep2((E, internal_dim)),                            # Wk
                rep2((1, internal_dim)),                            # bk
                rep2((E, internal_dim)),                            # Wv
                rep2((1, internal_dim)),                            # bv
                rep2((internal_dim, embed_dims)),                   # Wo
                rep2((1, embed_dims)),                              # bo
            ],
            out_specs=pl.BlockSpec((None, Nq, embed_dims), lambda b: (b, 0, 0)),
            scratch_shapes=[pltpu.VMEM((Nq, internal_dim), jnp.float32)],
        ),
        compiler_params=pltpu.CompilerParams(
            dimension_semantics=("parallel",),   # batch axis -> megacore on v7x
        ),
    )(
        cast(q), cast(k), cast(v),
        cast(wq), bias(bq),
        cast(wk), bias(bk),
        cast(wv), bias(bv),
        cast(wo), bias(bo),
    )


# ----------------------------------------------------------------------------
# Parameter init (PyTorch-Linear-like uniform bound), weights stored (in, out)
# ----------------------------------------------------------------------------
def init_attention_params(key, embed_dims, num_heads, downsample_rate=1):
    internal_dim = embed_dims // downsample_rate
    assert internal_dim % num_heads == 0, "num_heads must divide embedding_dim."
    keys = jax.random.split(key, 8)

    def lin(kw, kb, fan_in, fan_out):
        bound = 1.0 / math.sqrt(fan_in)
        w = jax.random.uniform(kw, (fan_in, fan_out), jnp.float32, -bound, bound)
        b = jax.random.uniform(kb, (fan_out,), jnp.float32, -bound, bound)
        return w, b

    params = {
        "q_proj": lin(keys[0], keys[1], embed_dims, internal_dim),
        "k_proj": lin(keys[2], keys[3], embed_dims, internal_dim),
        "v_proj": lin(keys[4], keys[5], embed_dims, internal_dim),
        "out_proj": lin(keys[6], keys[7], internal_dim, embed_dims),
    }
    return params, internal_dim


# ----------------------------------------------------------------------------
# Pure-JAX f32 reference (for correctness check)
# ----------------------------------------------------------------------------
def attention_reference(params, q, k, v, num_heads, internal_dim, embed_dims):
    B, Nq, E = q.shape
    Nk = k.shape[1]
    Dh = internal_dim // num_heads
    qp = q @ params["q_proj"][0] + params["q_proj"][1]
    kp = k @ params["k_proj"][0] + params["k_proj"][1]
    vp = v @ params["v_proj"][0] + params["v_proj"][1]
    qh = qp.reshape(B, Nq, num_heads, Dh).transpose(0, 2, 1, 3)
    kh = kp.reshape(B, Nk, num_heads, Dh).transpose(0, 2, 1, 3)
    vh = vp.reshape(B, Nk, num_heads, Dh).transpose(0, 2, 1, 3)
    s = jnp.einsum("bhqd,bhkd->bhqk", qh, kh) / math.sqrt(Dh)
    p = jax.nn.softmax(s, axis=-1)
    oh = jnp.einsum("bhqk,bhkd->bhqd", p, vh)
    o = oh.transpose(0, 2, 1, 3).reshape(B, Nq, internal_dim)
    return o @ params["out_proj"][0] + params["out_proj"][1]


if __name__ == "__main__":
    embed_dims = 32
    num_heads = 4
    downsample_rate = 1
    B, Nq, Nk = 2, 8, 8

    key = jax.random.PRNGKey(0)
    kp_, kq, kk, kv = jax.random.split(key, 4)

    params, internal_dim = init_attention_params(
        kp_, embed_dims, num_heads, downsample_rate
    )

    q = jax.random.normal(kq, (B, Nq, embed_dims), jnp.float32)
    k = jax.random.normal(kk, (B, Nk, embed_dims), jnp.float32)
    v = jax.random.normal(kv, (B, Nk, embed_dims), jnp.float32)

    out = attention_forward(
        params, q, k, v,
        num_heads=num_heads, internal_dim=internal_dim, embed_dims=embed_dims,
    )
    out = jax.block_until_ready(out)

    ref = attention_reference(params, q, k, v, num_heads, internal_dim, embed_dims)
    assert out.shape == (B, Nq, embed_dims)
    # bf16 MXU operands with f32 accumulation -> compare with bf16-level tolerance.
    assert jnp.allclose(out, ref, atol=5e-2, rtol=5e-2), "mismatch vs reference"

    print("KERNEL_OK")
</pallas_src>

<mosaic_0001>
module attributes {stable_mosaic.version = 11 : i64} {
  func.func @_fused_attn_kernel(%arg0: i32, %arg1: memref<1x8x32xbf16, #tpu.memory_space<vmem>>, %arg2: memref<1x8x32xbf16, #tpu.memory_space<vmem>>, %arg3: memref<1x8x32xbf16, #tpu.memory_space<vmem>>, %arg4: memref<32x32xbf16, #tpu.memory_space<vmem>>, %arg5: memref<1x32xf32, #tpu.memory_space<vmem>>, %arg6: memref<32x32xbf16, #tpu.memory_space<vmem>>, %arg7: memref<1x32xf32, #tpu.memory_space<vmem>>, %arg8: memref<32x32xbf16, #tpu.memory_space<vmem>>, %arg9: memref<1x32xf32, #tpu.memory_space<vmem>>, %arg10: memref<32x32xbf16, #tpu.memory_space<vmem>>, %arg11: memref<1x32xf32, #tpu.memory_space<vmem>>, %arg12: memref<1x8x32xf32, #tpu.memory_space<vmem>>, %arg13: memref<8x32xf32, #tpu.memory_space<vmem>>) attributes {dimension_semantics = [#tpu.dimension_semantics<parallel>], iteration_bounds = array<i64: 2>, scalar_prefetch = 0 : i64, scratch_operands = 1 : i64, tpu.core_type = #tpu.core_type<tc>, window_params = [{transform_indices = @transform_0, window_bounds = array<i64: 1, 8, 32>}, {transform_indices = @transform_1, window_bounds = array<i64: 1, 8, 32>}, {transform_indices = @transform_2, window_bounds = array<i64: 1, 8, 32>}, {pipeline_mode = #tpu.pipeline_mode<synchronous>, transform_indices = @transform_3, window_bounds = array<i64: 32, 32>}, {pipeline_mode = #tpu.pipeline_mode<synchronous>, transform_indices = @transform_4, window_bounds = array<i64: 1, 32>}, {pipeline_mode = #tpu.pipeline_mode<synchronous>, transform_indices = @transform_5, window_bounds = array<i64: 32, 32>}, {pipeline_mode = #tpu.pipeline_mode<synchronous>, transform_indices = @transform_6, window_bounds = array<i64: 1, 32>}, {pipeline_mode = #tpu.pipeline_mode<synchronous>, transform_indices = @transform_7, window_bounds = array<i64: 32, 32>}, {pipeline_mode = #tpu.pipeline_mode<synchronous>, transform_indices = @transform_8, window_bounds = array<i64: 1, 32>}, {pipeline_mode = #tpu.pipeline_mode<synchronous>, transform_indices = @transform_9, window_bounds = array<i64: 32, 32>}, {pipeline_mode = #tpu.pipeline_mode<synchronous>, transform_indices = @transform_10, window_bounds = array<i64: 1, 32>}, {transform_indices = @transform_11, window_bounds = array<i64: 1, 8, 32>}]} {
    %c0 = arith.constant 0 : index
    %c0_0 = arith.constant 0 : index
    %c0_1 = arith.constant 0 : index
    %0 = vector.load %arg1[%c0, %c0_0, %c0_1] : memref<1x8x32xbf16, #tpu.memory_space<vmem>>, vector<1x8x32xbf16>
    %1 = vector.shape_cast %0 : vector<1x8x32xbf16> to vector<8x32xbf16>
    %c0_2 = arith.constant 0 : index
    %c0_3 = arith.constant 0 : index
    %2 = vector.load %arg4[%c0_2, %c0_3] : memref<32x32xbf16, #tpu.memory_space<vmem>>, vector<32x32xbf16>
    %cst = arith.constant dense<0.000000e+00> : vector<8x32xf32>
    %3 = tpu.matmul %1, %2, %cst {dimension_numbers = #tpu.dot_dimension_numbers<[1], [0], [0], [1], [0, 0, 1, 1], [], []>} : vector<8x32xbf16>, vector<32x32xbf16>, vector<8x32xf32> -> vector<8x32xf32>
    %c0_4 = arith.constant 0 : index
    %c0_5 = arith.constant 0 : index
    %4 = vector.load %arg5[%c0_4, %c0_5] : memref<1x32xf32, #tpu.memory_space<vmem>>, vector<1x32xf32>
    %5 = vector.broadcast %4 : vector<1x32xf32> to vector<8x32xf32>
    %6 = arith.addf %3, %5 : vector<8x32xf32>
    %7 = arith.truncf %6 : vector<8x32xf32> to vector<8x32xbf16>
    %c0_6 = arith.constant 0 : index
    %c0_7 = arith.constant 0 : index
    %c0_8 = arith.constant 0 : index
    %8 = vector.load %arg2[%c0_6, %c0_7, %c0_8] : memref<1x8x32xbf16, #tpu.memory_space<vmem>>, vector<1x8x32xbf16>
    %9 = vector.shape_cast %8 : vector<1x8x32xbf16> to vector<8x32xbf16>
    %c0_9 = arith.constant 0 : index
    %c0_10 = arith.constant 0 : index
    %10 = vector.load %arg6[%c0_9, %c0_10] : memref<32x32xbf16, #tpu.memory_space<vmem>>, vector<32x32xbf16>
    %cst_11 = arith.constant dense<0.000000e+00> : vector<8x32xf32>
    %11 = tpu.matmul %9, %10, %cst_11 {dimension_numbers = #tpu.dot_dimension_numbers<[1], [0], [0], [1], [0, 0, 1, 1], [], []>} : vector<8x32xbf16>, vector<32x32xbf16>, vector<8x32xf32> -> vector<8x32xf32>
    %c0_12 = arith.constant 0 : index
    %c0_13 = arith.constant 0 : index
    %12 = vector.load %arg7[%c0_12, %c0_13] : memref<1x32xf32, #tpu.memory_space<vmem>>, vector<1x32xf32>
    %13 = vector.broadcast %12 : vector<1x32xf32> to vector<8x32xf32>
    %14 = arith.addf %11, %13 : vector<8x32xf32>
    %15 = arith.truncf %14 : vector<8x32xf32> to vector<8x32xbf16>
    %c0_14 = arith.constant 0 : index
    %c0_15 = arith.constant 0 : index
    %c0_16 = arith.constant 0 : index
    %16 = vector.load %arg3[%c0_14, %c0_15, %c0_16] : memref<1x8x32xbf16, #tpu.memory_space<vmem>>, vector<1x8x32xbf16>
    %17 = vector.shape_cast %16 : vector<1x8x32xbf16> to vector<8x32xbf16>
    %c0_17 = arith.constant 0 : index
    %c0_18 = arith.constant 0 : index
    %18 = vector.load %arg8[%c0_17, %c0_18] : memref<32x32xbf16, #tpu.memory_space<vmem>>, vector<32x32xbf16>
    %cst_19 = arith.constant dense<0.000000e+00> : vector<8x32xf32>
    %19 = tpu.matmul %17, %18, %cst_19 {dimension_numbers = #tpu.dot_dimension_numbers<[1], [0], [0], [1], [0, 0, 1, 1], [], []>} : vector<8x32xbf16>, vector<32x32xbf16>, vector<8x32xf32> -> vector<8x32xf32>
    %c0_20 = arith.constant 0 : index
    %c0_21 = arith.constant 0 : index
    %20 = vector.load %arg9[%c0_20, %c0_21] : memref<1x32xf32, #tpu.memory_space<vmem>>, vector<1x32xf32>
    %21 = vector.broadcast %20 : vector<1x32xf32> to vector<8x32xf32>
    %22 = arith.addf %19, %21 : vector<8x32xf32>
    %23 = arith.truncf %22 : vector<8x32xf32> to vector<8x32xbf16>
    %24 = vector.extract_strided_slice %7 {offsets = [0, 0], sizes = [8, 8], strides = [1, 1]} : vector<8x32xbf16> to vector<8x8xbf16>
    %25 = vector.extract_strided_slice %15 {offsets = [0, 0], sizes = [8, 8], strides = [1, 1]} : vector<8x32xbf16> to vector<8x8xbf16>
    %26 = vector.extract_strided_slice %23 {offsets = [0, 0], sizes = [8, 8], strides = [1, 1]} : vector<8x32xbf16> to vector<8x8xbf16>
    %cst_22 = arith.constant dense<0.000000e+00> : vector<8x8xf32>
    %27 = tpu.matmul %24, %25, %cst_22 {dimension_numbers = #tpu.dot_dimension_numbers<[1], [1], [0], [0], [0, 0, 1, 0], [], []>} : vector<8x8xbf16>, vector<8x8xbf16>, vector<8x8xf32> -> vector<8x8xf32>
    %cst_23 = arith.constant 0.353553385 : f32
    %28 = vector.broadcast %cst_23 : f32 to vector<8x8xf32>
    %29 = arith.mulf %27, %28 : vector<8x8xf32>
    %cst_24 = arith.constant dense<0xFF800000> : vector<8xf32>
    %30 = vector.multi_reduction <maximumf>, %29, %cst_24 [1] : vector<8x8xf32> to vector<8xf32>
    %31 = vector.shape_cast %30 : vector<8xf32> to vector<8x1xf32>
    %32 = vector.broadcast %31 : vector<8x1xf32> to vector<8x8xf32>
    %33 = arith.subf %29, %32 : vector<8x8xf32>
    %34 = math.exp %33 : vector<8x8xf32>
    %cst_25 = arith.constant dense<0.000000e+00> : vector<8xf32>
    %35 = vector.multi_reduction <add>, %34, %cst_25 [1] : vector<8x8xf32> to vector<8xf32>
    %36 = vector.shape_cast %35 : vector<8xf32> to vector<8x1xf32>
    %37 = tpu.reciprocal %36 {approx = true} : vector<8x1xf32> -> vector<8x1xf32>
    %38 = vector.broadcast %37 : vector<8x1xf32> to vector<8x8xf32>
    %39 = arith.mulf %34, %38 : vector<8x8xf32>
    %40 = arith.truncf %39 : vector<8x8xf32> to vector<8x8xbf16>
    %cst_26 = arith.constant dense<0.000000e+00> : vector<8x8xf32>
    %41 = tpu.matmul %40, %26, %cst_26 {dimension_numbers = #tpu.dot_dimension_numbers<[1], [0], [0], [1], [0, 0, 1, 1], [], []>} : vector<8x8xbf16>, vector<8x8xbf16>, vector<8x8xf32> -> vector<8x8xf32>
    %c0_27 = arith.constant 0 : index
    %c0_28 = arith.constant 0 : index
    %42 = vector.load %arg13[%c0_27, %c0_28] : memref<8x32xf32, #tpu.memory_space<vmem>>, vector<8x8xf32>
    tpu.vector_store %arg13[%c0_27, %c0_28], %41 {strides = array<i32>} : memref<8x32xf32, #tpu.memory_space<vmem>>, vector<8x8xf32>,
    %43 = vector.extract_strided_slice %7 {offsets = [0, 8], sizes = [8, 8], strides = [1, 1]} : vector<8x32xbf16> to vector<8x8xbf16>
    %44 = vector.extract_strided_slice %15 {offsets = [0, 8], sizes = [8, 8], strides = [1, 1]} : vector<8x32xbf16> to vector<8x8xbf16>
    %45 = vector.extract_strided_slice %23 {offsets = [0, 8], sizes = [8, 8], strides = [1, 1]} : vector<8x32xbf16> to vector<8x8xbf16>
    %cst_29 = arith.constant dense<0.000000e+00> : vector<8x8xf32>
    %46 = tpu.matmul %43, %44, %cst_29 {dimension_numbers = #tpu.dot_dimension_numbers<[1], [1], [0], [0], [0, 0, 1, 0], [], []>} : vector<8x8xbf16>, vector<8x8xbf16>, vector<8x8xf32> -> vector<8x8xf32>
    %cst_30 = arith.constant 0.353553385 : f32
    %47 = vector.broadcast %cst_30 : f32 to vector<8x8xf32>
    %48 = arith.mulf %46, %47 : vector<8x8xf32>
    %cst_31 = arith.constant dense<0xFF800000> : vector<8xf32>
    %49 = vector.multi_reduction <maximumf>, %48, %cst_31 [1] : vector<8x8xf32> to vector<8xf32>
    %50 = vector.shape_cast %49 : vector<8xf32> to vector<8x1xf32>
    %51 = vector.broadcast %50 : vector<8x1xf32> to vector<8x8xf32>
    %52 = arith.subf %48, %51 : vector<8x8xf32>
    %53 = math.exp %52 : vector<8x8xf32>
    %cst_32 = arith.constant dense<0.000000e+00> : vector<8xf32>
    %54 = vector.multi_reduction <add>, %53, %cst_32 [1] : vector<8x8xf32> to vector<8xf32>
    %55 = vector.shape_cast %54 : vector<8xf32> to vector<8x1xf32>
    %56 = tpu.reciprocal %55 {approx = true} : vector<8x1xf32> -> vector<8x1xf32>
    %57 = vector.broadcast %56 : vector<8x1xf32> to vector<8x8xf32>
    %58 = arith.mulf %53, %57 : vector<8x8xf32>
    %59 = arith.truncf %58 : vector<8x8xf32> to vector<8x8xbf16>
    %cst_33 = arith.constant dense<0.000000e+00> : vector<8x8xf32>
    %60 = tpu.matmul %59, %45, %cst_33 {dimension_numbers = #tpu.dot_dimension_numbers<[1], [0], [0], [1], [0, 0, 1, 1], [], []>} : vector<8x8xbf16>, vector<8x8xbf16>, vector<8x8xf32> -> vector<8x8xf32>
    %c0_34 = arith.constant 0 : index
    %c8 = arith.constant 8 : index
    %61 = vector.load %arg13[%c0_34, %c8] : memref<8x32xf32, #tpu.memory_space<vmem>>, vector<8x8xf32>
    tpu.vector_store %arg13[%c0_34, %c8], %60 {strides = array<i32>} : memref<8x32xf32, #tpu.memory_space<vmem>>, vector<8x8xf32>,
    %62 = vector.extract_strided_slice %7 {offsets = [0, 16], sizes = [8, 8], strides = [1, 1]} : vector<8x32xbf16> to vector<8x8xbf16>
    %63 = vector.extract_strided_slice %15 {offsets = [0, 16], sizes = [8, 8], strides = [1, 1]} : vector<8x32xbf16> to vector<8x8xbf16>
    %64 = vector.extract_strided_slice %23 {offsets = [0, 16], sizes = [8, 8], strides = [1, 1]} : vector<8x32xbf16> to vector<8x8xbf16>
    %cst_35 = arith.constant dense<0.000000e+00> : vector<8x8xf32>
    %65 = tpu.matmul %62, %63, %cst_35 {dimension_numbers = #tpu.dot_dimension_numbers<[1], [1], [0], [0], [0, 0, 1, 0], [], []>} : vector<8x8xbf16>, vector<8x8xbf16>, vector<8x8xf32> -> vector<8x8xf32>
    %cst_36 = arith.constant 0.353553385 : f32
    %66 = vector.broadcast %cst_36 : f32 to vector<8x8xf32>
    %67 = arith.mulf %65, %66 : vector<8x8xf32>
    %cst_37 = arith.constant dense<0xFF800000> : vector<8xf32>
    %68 = vector.multi_reduction <maximumf>, %67, %cst_37 [1] : vector<8x8xf32> to vector<8xf32>
    %69 = vector.shape_cast %68 : vector<8xf32> to vector<8x1xf32>
    %70 = vector.broadcast %69 : vector<8x1xf32> to vector<8x8xf32>
    %71 = arith.subf %67, %70 : vector<8x8xf32>
    %72 = math.exp %71 : vector<8x8xf32>
    %cst_38 = arith.constant dense<0.000000e+00> : vector<8xf32>
    %73 = vector.multi_reduction <add>, %72, %cst_38 [1] : vector<8x8xf32> to vector<8xf32>
    %74 = vector.shape_cast %73 : vector<8xf32> to vector<8x1xf32>
    %75 = tpu.reciprocal %74 {approx = true} : vector<8x1xf32> -> vector<8x1xf32>
    %76 = vector.broadcast %75 : vector<8x1xf32> to vector<8x8xf32>
    %77 = arith.mulf %72, %76 : vector<8x8xf32>
    %78 = arith.truncf %77 : vector<8x8xf32> to vector<8x8xbf16>
    %cst_39 = arith.constant dense<0.000000e+00> : vector<8x8xf32>
    %79 = tpu.matmul %78, %64, %cst_39 {dimension_numbers = #tpu.dot_dimension_numbers<[1], [0], [0], [1], [0, 0, 1, 1], [], []>} : vector<8x8xbf16>, vector<8x8xbf16>, vector<8x8xf32> -> vector<8x8xf32>
    %c0_40 = arith.constant 0 : index
    %c16 = arith.constant 16 : index
    %80 = vector.load %arg13[%c0_40, %c16] : memref<8x32xf32, #tpu.memory_space<vmem>>, vector<8x8xf32>
    tpu.vector_store %arg13[%c0_40, %c16], %79 {strides = array<i32>} : memref<8x32xf32, #tpu.memory_space<vmem>>, vector<8x8xf32>,
    %81 = vector.extract_strided_slice %7 {offsets = [0, 24], sizes = [8, 8], strides = [1, 1]} : vector<8x32xbf16> to vector<8x8xbf16>
    %82 = vector.extract_strided_slice %15 {offsets = [0, 24], sizes = [8, 8], strides = [1, 1]} : vector<8x32xbf16> to vector<8x8xbf16>
    %83 = vector.extract_strided_slice %23 {offsets = [0, 24], sizes = [8, 8], strides = [1, 1]} : vector<8x32xbf16> to vector<8x8xbf16>
    %cst_41 = arith.constant dense<0.000000e+00> : vector<8x8xf32>
    %84 = tpu.matmul %81, %82, %cst_41 {dimension_numbers = #tpu.dot_dimension_numbers<[1], [1], [0], [0], [0, 0, 1, 0], [], []>} : vector<8x8xbf16>, vector<8x8xbf16>, vector<8x8xf32> -> vector<8x8xf32>
    %cst_42 = arith.constant 0.353553385 : f32
    %85 = vector.broadcast %cst_42 : f32 to vector<8x8xf32>
    %86 = arith.mulf %84, %85 : vector<8x8xf32>
    %cst_43 = arith.constant dense<0xFF800000> : vector<8xf32>
    %87 = vector.multi_reduction <maximumf>, %86, %cst_43 [1] : vector<8x8xf32> to vector<8xf32>
    %88 = vector.shape_cast %87 : vector<8xf32> to vector<8x1xf32>
    %89 = vector.broadcast %88 : vector<8x1xf32> to vector<8x8xf32>
    %90 = arith.subf %86, %89 : vector<8x8xf32>
    %91 = math.exp %90 : vector<8x8xf32>
    %cst_44 = arith.constant dense<0.000000e+00> : vector<8xf32>
    %92 = vector.multi_reduction <add>, %91, %cst_44 [1] : vector<8x8xf32> to vector<8xf32>
    %93 = vector.shape_cast %92 : vector<8xf32> to vector<8x1xf32>
    %94 = tpu.reciprocal %93 {approx = true} : vector<8x1xf32> -> vector<8x1xf32>
    %95 = vector.broadcast %94 : vector<8x1xf32> to vector<8x8xf32>
    %96 = arith.mulf %91, %95 : vector<8x8xf32>
    %97 = arith.truncf %96 : vector<8x8xf32> to vector<8x8xbf16>
    %cst_45 = arith.constant dense<0.000000e+00> : vector<8x8xf32>
    %98 = tpu.matmul %97, %83, %cst_45 {dimension_numbers = #tpu.dot_dimension_numbers<[1], [0], [0], [1], [0, 0, 1, 1], [], []>} : vector<8x8xbf16>, vector<8x8xbf16>, vector<8x8xf32> -> vector<8x8xf32>
    %c0_46 = arith.constant 0 : index
    %c24 = arith.constant 24 : index
    %99 = vector.load %arg13[%c0_46, %c24] : memref<8x32xf32, #tpu.memory_space<vmem>>, vector<8x8xf32>
    tpu.vector_store %arg13[%c0_46, %c24], %98 {strides = array<i32>} : memref<8x32xf32, #tpu.memory_space<vmem>>, vector<8x8xf32>,
    %c0_47 = arith.constant 0 : index
    %c0_48 = arith.constant 0 : index
    %100 = vector.load %arg13[%c0_47, %c0_48] : memref<8x32xf32, #tpu.memory_space<vmem>>, vector<8x32xf32>
    %101 = arith.truncf %100 : vector<8x32xf32> to vector<8x32xbf16>
    %c0_49 = arith.constant 0 : index
    %c0_50 = arith.constant 0 : index
    %102 = vector.load %arg10[%c0_49, %c0_50] : memref<32x32xbf16, #tpu.memory_space<vmem>>, vector<32x32xbf16>
    %cst_51 = arith.constant dense<0.000000e+00> : vector<8x32xf32>
    %103 = tpu.matmul %101, %102, %cst_51 {dimension_numbers = #tpu.dot_dimension_numbers<[1], [0], [0], [1], [0, 0, 1, 1], [], []>} : vector<8x32xbf16>, vector<32x32xbf16>, vector<8x32xf32> -> vector<8x32xf32>
    %c0_52 = arith.constant 0 : index
    %c0_53 = arith.constant 0 : index
    %104 = vector.load %arg11[%c0_52, %c0_53] : memref<1x32xf32, #tpu.memory_space<vmem>>, vector<1x32xf32>
    %105 = vector.broadcast %104 : vector<1x32xf32> to vector<8x32xf32>
    %106 = arith.addf %103, %105 : vector<8x32xf32>
    %c0_54 = arith.constant 0 : index
    %c0_55 = arith.constant 0 : index
    %c0_56 = arith.constant 0 : index
    %107 = vector.load %arg12[%c0_54, %c0_55, %c0_56] : memref<1x8x32xf32, #tpu.memory_space<vmem>>, vector<1x8x32xf32>
    %108 = vector.shape_cast %107 : vector<1x8x32xf32> to vector<8x32xf32>
    %109 = vector.shape_cast %106 : vector<8x32xf32> to vector<1x8x32xf32>
    tpu.vector_store %arg12[%c0_54, %c0_55, %c0_56], %109 {strides = array<i32>} : memref<1x8x32xf32, #tpu.memory_space<vmem>>, vector<1x8x32xf32>,
    return
  }
  func.func @transform_0(%arg0: i32) -> (i32, i32, i32) {
    %c0_i32 = arith.constant 0 : i32
    %c0_i32_0 = arith.constant 0 : i32
    %c0_i32_1 = arith.constant 0 : i32
    return %arg0, %c0_i32, %c0_i32_0 : i32, i32, i32
  }
  func.func @transform_1(%arg0: i32) -> (i32, i32, i32) {
    %c0_i32 = arith.constant 0 : i32
    %c0_i32_0 = arith.constant 0 : i32
    %c0_i32_1 = arith.constant 0 : i32
    return %arg0, %c0_i32, %c0_i32_0 : i32, i32, i32
  }
  func.func @transform_2(%arg0: i32) -> (i32, i32, i32) {
    %c0_i32 = arith.constant 0 : i32
    %c0_i32_0 = arith.constant 0 : i32
    %c0_i32_1 = arith.constant 0 : i32
    return %arg0, %c0_i32, %c0_i32_0 : i32, i32, i32
  }
  func.func @transform_3(%arg0: i32) -> (i32, i32) {
    %c0_i32 = arith.constant 0 : i32
    %c0_i32_0 = arith.constant 0 : i32
    %c0_i32_1 = arith.constant 0 : i32
    return %c0_i32, %c0_i32_0 : i32, i32
  }
  func.func @transform_4(%arg0: i32) -> (i32, i32) {
    %c0_i32 = arith.constant 0 : i32
    %c0_i32_0 = arith.constant 0 : i32
    %c0_i32_1 = arith.constant 0 : i32
    return %c0_i32, %c0_i32_0 : i32, i32
  }
  func.func @transform_5(%arg0: i32) -> (i32, i32) {
    %c0_i32 = arith.constant 0 : i32
    %c0_i32_0 = arith.constant 0 : i32
    %c0_i32_1 = arith.constant 0 : i32
    return %c0_i32, %c0_i32_0 : i32, i32
  }
  func.func @transform_6(%arg0: i32) -> (i32, i32) {
    %c0_i32 = arith.constant 0 : i32
    %c0_i32_0 = arith.constant 0 : i32
    %c0_i32_1 = arith.constant 0 : i32
    return %c0_i32, %c0_i32_0 : i32, i32
  }
  func.func @transform_7(%arg0: i32) -> (i32, i32) {
    %c0_i32 = arith.constant 0 : i32
    %c0_i32_0 = arith.constant 0 : i32
    %c0_i32_1 = arith.constant 0 : i32
    return %c0_i32, %c0_i32_0 : i32, i32
  }
  func.func @transform_8(%arg0: i32) -> (i32, i32) {
    %c0_i32 = arith.constant 0 : i32
    %c0_i32_0 = arith.constant 0 : i32
    %c0_i32_1 = arith.constant 0 : i32
    return %c0_i32, %c0_i32_0 : i32, i32
  }
  func.func @transform_9(%arg0: i32) -> (i32, i32) {
    %c0_i32 = arith.constant 0 : i32
    %c0_i32_0 = arith.constant 0 : i32
    %c0_i32_1 = arith.constant 0 : i32
    return %c0_i32, %c0_i32_0 : i32, i32
  }
  func.func @transform_10(%arg0: i32) -> (i32, i32) {
    %c0_i32 = arith.constant 0 : i32
    %c0_i32_0 = arith.constant 0 : i32
    %c0_i32_1 = arith.constant 0 : i32
    return %c0_i32, %c0_i32_0 : i32, i32
  }
  func.func @transform_11(%arg0: i32) -> (i32, i32, i32) {
    %c0_i32 = arith.constant 0 : i32
    %c0_i32_0 = arith.constant 0 : i32
    %c0_i32_1 = arith.constant 0 : i32
    return %arg0, %c0_i32, %c0_i32_0 : i32, i32, i32
  }
}

</mosaic_0001>

<bundles_post_ra>
// kernel: tpu_custom_call.1
= control target key start
LH: loop header
LB: loop body
LE: loop exit
PB: predicated region body
PF: predicated region fallthrough
CT: control target
= control target key end

     0   :  { %s2452_s0 = inlined_call_operand.hbm [shape: bf16[2,8,32], index: 0, kind: input, shape index: {}]   ;;  %s2453_s1 = inlined_call_operand.hbm [shape: bf16[2,8,32], index: 1, kind: input, shape index: {}]   ;;  %s2454_s2 = inlined_call_operand.hbm [shape: bf16[2,8,32], index: 2, kind: input, shape index: {}]   ;;  %s2455_s3 = inlined_call_operand.hbm [shape: bf16[32,32], index: 3, kind: input, shape index: {}]   ;;  %s2456_s4 = inlined_call_operand.vmem [shape: f32[1,32], index: 4, kind: input, shape index: {}]   ;;  %s2457_s5 = inlined_call_operand.vmem [shape: bf16[32,32], index: 5, kind: input, shape index: {}]   ;;  %s2458_s6 = inlined_call_operand.vmem [shape: f32[1,32], index: 6, kind: input, shape index: {}]   ;;  %s2459_s7 = inlined_call_operand.hbm [shape: bf16[32,32], index: 7, kind: input, shape index: {}]   ;;  %s2460_s8 = inlined_call_operand.hbm [shape: f32[1,32], index: 8, kind: input, shape index: {}]   ;;  %s2461_s9 = inlined_call_operand.vmem [shape: bf16[32,32], index: 9, kind: input, shape index: {}]   ;;  %s2462_s10 = inlined_call_operand.vmem [shape: f32[1,32], index: 10, kind: input, shape index: {}]   ;;  %s2463_s11 = inlined_call_operand.hbm [shape: f32[2,8,32], index: 11, kind: output, shape index: {}]  }
   0x1   :  { %2488 = sst [smem:[#allocation26_spill]] %s2453_s1 }
   0x2   :  { %2489 = sst [smem:[#allocation27_spill]] %s2455_s3 }
   0x3   :  { %2490 = sst [smem:[#allocation28_spill]] %s2456_s4 }
   0x4   :  { %2491 = sst [smem:[#allocation29_spill]] %s2461_s9 }
   0x5   :  { %2492 = sst [smem:[#allocation30_spill]] %s2462_s10 }
   0x6   :  { %2493 = sst [smem:[#allocation31_spill]] %s2463_s11 }
   0x7   :  { %16 = vsyncpa [#allocation4], 0 }
   0x8   :  { %18 = vsyncpa [#allocation4 + $0x1], 0 }
   0x9   :  { %19 = vsyncpa [#allocation7], 0 }
   0xa   :  { %21 = vsyncpa [#allocation7 + $0x1], 0 }
   0xb   :  { %22 = vsyncpa [#allocation10], 0 }
   0xc   :  { %23 = vsyncpa [#allocation13], 0 }
   0xd   :  { %24 = vsyncpa [#allocation5], 0 }
   0xe   :  { %26 = vsyncpa [#allocation5 + $0x1], 0  ;;  %s2016_s17 = smov 0   ;;  %s2018_s18 = smov 0  }
   0xf   :  { %s2020_s19 = smov 0   ;;  %s2022_s20 = smov 0  }
  0x10 LB: > { %2494 = sst [smem:[#allocation20_spill]] %s1925_s17  ;;  %s2037_s21 = sadd.s32 4294967295, %s1937_s20   ;;  %s1937_s20 = sphi %s2022_s20, %s2536_s20   ;;  %s1933_s19 = sphi %s2020_s19, %s2540_s19   ;;  %s1929_s18 = sphi %s2018_s18, %s2539_s18   ;;  %s1925_s17 = sphi %s2016_s17, %s2538_s17  }
  0x11   : > { %2495 = sst [smem:[#allocation21_spill]] %s1937_s20  ;;  %s1408_s22 = sadd.s32 4294967294, %s1937_s20  }
  0x12   : > { %p52_p0 = scmp.ne.s32.totalorder %s1929_s18, %s1925_s17  ;;  %p2466_p1 = scmp.eq.s32.totalorder %s2037_s21, 0 }
  0x13   : > { %p302_p3 = scmp.eq.s32.totalorder %s1408_s22, 1  ;;  %p1409_p5 = scmp.ge.s32.totalorder %s1937_s20, 1 }
  0x14   : > { %p2046_p4 = por %p2466_p1, %p52_p0  ;;  %p309_p7 = scmp.lt.s32.totalorder %s1937_s20, 3 }
  0x15   : > { %p2051_p6 = por %p302_p3, %p52_p0  ;;  %s1939_s26 = smov [#allocation9]  }
  0x16   : > { %s2496_s23 = scalar_select %p2046_p4, 1, 0 }
  0x17   : > { %s2497_s24 = scalar_select %p2051_p6, 1, 0 }
  0x18   : > { %p2056_p8 = pnand %p1409_p5, %p309_p7  ;;  %s321_s27 = sshll.u32 %s1939_s26, 4  ;;  %s2060_s27 = int_to_ptr.vmem [resolvable:$true] %s321_s27 }
  0x19   : > { %2498 = sst [smem:[#allocation22_spill]] %s2497_s24  ;;  %s2072_s29 = sadd.s32 1, %s1937_s20  }
  0x1a   : > { %s2499_s25 = scalar_select %p2056_p8, 1, 0 }
  0x1b   : > { %p1584_p9 = pneg %p2056_p8  ;;  %2501 = sst [smem:[#allocation23_spill]] %s2072_s29 }
  0x1c   : > { %s39_s30 = sadd.s32 1, %s1933_s19  ;;  %s36_s12 = ssub.s32 %s1937_s20, %s2072_s29 }
  0x1d   : > { %p2067_p11 = pnand %p1584_p9, %p2466_p1  ;;  %s2502_s3 = sld [smem:[#allocation27_spill]] }
  0x1f   : > { %s2500_s28 = scalar_select %p2067_p11, 1, 0 }
  0x20   : > { %p2085_p13 = pneg %p2067_p11 }
  0x22   : > { %s2503_s26 = scalar_select %p2085_p13, 1, 0 }
  0x23   : > { %s1685_s15 = scalar_lea.hbm %s2502_s3, 256 }
  0x24   : > { %p1686_p12 = scmp.ne.s32.totalorder %s2502_s3, %s1685_s15  ;;  %p1692_p5 = scmp.lt.u32.totalorder %s1685_s15, %s2502_s3 }
  0x26   : > { %p1688_p0 = pnand %p2085_p13, %p1686_p12 }
  0x28   : > { %p1689_p3 = pneg %p1688_p0 }
  0x2a   : > { %p1694_p7 = pnand %p1692_p5, %p1689_p3 }
  0x2c   : > { %1697 = shalt.err (!%p1694_p7)
}
  0x2d   : > { %s1698_s13 = scalar_lea.vmem %s2060_s27, 256  ;;  %p1706_p2 = scmp.lt.s32.totalorder %s2060_s27, %s2060_s27 }
  0x2e   : > { %p1699_p9 = scmp.ne.s32.totalorder %s2060_s27, %s1698_s13  ;;  %p1707_p6 = scmp.lt.s32.totalorder %s1698_s13, %s1698_s13 }
  0x30   : > { %p1701_p10 = pnand %p1699_p9, %p2085_p13  ;;  %p1708_p12 = por %p1707_p6, %p1706_p2 }
  0x32   : > { %p1702_p1 = pneg %p1701_p10 }
  0x34   : > { %p1709_p0 = pnand %p1708_p12, %p1702_p1 }
  0x36   : > { %1712 = shalt.err (!%p1709_p0)
}
  0x37   : > { %s2470_s14 = smov 64   ;;  %s2471_s17 = smov 4  }
  0x38   : > { %1587 = dma.hbm_to_vmem [thread:$0]  (!%p2067_p11), %s2502_s3, 256, %s2060_s27, [#allocation10], %s2470_s14, %s2470_s14, %s2471_s17  }
  0x39   : > { %p37_p1 = scmp.eq.s32.totalorder %s36_s12, 0  ;;  %p46_p2 = scmp.ne.s32.totalorder %s1933_s19, %s1929_s18 }
  0x3a   : > { %p47_p6 = scmp.eq.s32.totalorder %s1937_s20, 0  ;;  %p1611_p10 = scmp.lt.s32.totalorder %s1937_s20, 2 }
  0x3b   : > { %s2114_s16 = scalar_select %p37_p1, %s1933_s19, %s39_s30  }
  0x3c   : > { %p48_p3 = por %p47_p6, %p46_p2  ;;  %p2505_p5 = scmp.eq.s32.totalorder %s2037_s21, 1 }
  0x3d   : > { %2504 = sst [smem:[#allocation24_spill]] %s2114_s16  ;;  %s2472_s13 = sand.u32 1, %s1933_s19  }
  0x3e   : > { %p2118_p7 = por %p2505_p5, %p46_p2  ;;  %s2124_s29 = sshll.u32 %s1937_s20, 6 }
  0x3f   : > { %s2128_s11 = sshll.u32 %s2472_s13, 2  ;;  %p2130_p9 = pnand %p1611_p10, %p48_p3 }
  0x40   : > { %s2506_s22 = scalar_select %p2118_p7, 1, 0 }
  0x41   : > { %s2508_s27 = scalar_select %p2130_p9, 1, 0 }
  0x42   : > { %2507 = sst [smem:[#allocation25_spill]] %s2506_s22  ;;  %s392_s30 = sand.u32 1, %s1937_s20  }
  0x43   : > { %s2509_s1 = sld [smem:[#allocation26_spill]]  ;;  %s396_s14 = scalar_lea.vmem [#allocation6], %s2128_s11 }
  0x44   : > { %s403_s17 = sshll.u32 %s396_s14, 4  ;;  %s2144_s13 = scalar_lea.sflag [#allocation7], %s392_s30  ;;  %s2142_s17 = int_to_ptr.vmem [resolvable:$true] %s403_s17 }
  0x45   : > { %p2150_p0 = pneg %p2130_p9 }
  0x47   : > { %s2510_s16 = scalar_select %p2150_p0, 1, 0 }
  0x49   : > { %s2139_s15 = scalar_lea.hbm %s2509_s1, %s2124_s29  ;;  %s1718_s20 = scalar_lea.hbm %s2509_s1, 128 }
  0x4a   : > { %s1713_s3 = scalar_lea.hbm %s2139_s15, 64  ;;  %p1719_p6 = scmp.lt.u32.totalorder %s2139_s15, %s2509_s1 }
  0x4b   : > { %p1714_p12 = scmp.ne.s32.totalorder %s2139_s15, %s1713_s3  ;;  %p1720_p10 = scmp.lt.u32.totalorder %s1718_s20, %s1713_s3 }
  0x4c   : > { %p1722_p5 = scmp.lt.u32.totalorder %s1713_s3, %s2139_s15 }
  0x4d   : > { %p1716_p1 = pnand %p2150_p0, %p1714_p12  ;;  %p1721_p3 = por %p1720_p10, %p1719_p6 }
  0x4f   : > { %p1717_p2 = pneg %p1716_p1  ;;  %p1723_p7 = por %p1722_p5, %p1721_p3 }
  0x51   : > { %p1724_p4 = pnand %p1723_p7, %p1717_p2 }
  0x53   : > { %1727 = shalt.err (!%p1724_p4)
}
  0x54   : > { %s1728_s30 = scalar_lea.vmem %s2142_s17, 64  ;;  %s1942_s12 = smov [#allocation6]  }
  0x55   : > { %p1729_p12 = scmp.ne.s32.totalorder %s2142_s17, %s1728_s30  ;;  %s1733_s24 = sshll.u32 %s1942_s12, 4  ;;  %s1734_s24 = int_to_ptr.vmem [resolvable:$false] %s1733_s24 }
  0x56   : > { %s1735_s22 = scalar_lea.vmem %s1734_s24, 128  ;;  %p1736_p11 = scmp.lt.s32.totalorder %s2142_s17, %s1734_s24 }
  0x57   : > { %p1731_p1 = pnand %p1729_p12, %p2150_p0  ;;  %p1737_p13 = scmp.lt.s32.totalorder %s1735_s22, %s1728_s30 }
  0x59   : > { %p1732_p8 = pneg %p1731_p1  ;;  %p1738_p6 = por %p1737_p13, %p1736_p11 }
  0x5b   : > { %p1739_p10 = pnand %p1738_p6, %p1732_p8 }
  0x5d   : > { %1742 = shalt.err (!%p1739_p10)
}
  0x5e   : > { %1600 = dma.hbm_to_vmem [thread:$0]  (!%p2130_p9), %s2139_s15, 64, %s2142_s17, %s2144_s13  }
  0x5f   : > { %s1943_s3 = smov [#allocation11]   ;;  %s1944_s14 = smov [#allocation12]  }
  0x60   : > { %s343_s20 = sshll.u32 %s1943_s3, 4  ;;  %s357_s1 = sshll.u32 %s1944_s14, 4  ;;  %s344_s20 = int_to_ptr.vmem [resolvable:$true] %s343_s20  ;;  %s358_s1 = int_to_ptr.vmem [resolvable:$true] %s357_s1 }
  0x61   : > { %s1743_s24 = scalar_lea.hbm %s2459_s7, 256  ;;  %p2511_p8 = scmp.ne.s32.totalorder %s2503_s26, 0 }
  0x62   : > { %p1744_p4 = scmp.ne.s32.totalorder %s2459_s7, %s1743_s24  ;;  %p1750_p7 = scmp.lt.u32.totalorder %s1743_s24, %s2459_s7 }
  0x64   : > { %p1746_p11 = pnand %p1744_p4, %p2511_p8 }
  0x66   : > { %p1747_p13 = pneg %p1746_p11 }
  0x68   : > { %p1752_p2 = pnand %p1750_p7, %p1747_p13 }
  0x6a   : > { %1755 = shalt.err (!%p1752_p2)
}
  0x6b   : > { %s1756_s17 = scalar_lea.vmem %s344_s20, 256  ;;  %p1764_p1 = scmp.lt.s32.totalorder %s344_s20, %s344_s20 }
  0x6c   : > { %p1757_p3 = scmp.ne.s32.totalorder %s344_s20, %s1756_s17  ;;  %p1765_p6 = scmp.lt.s32.totalorder %s1756_s17, %s1756_s17 }
  0x6e   : > { %p1759_p5 = pnand %p1757_p3, %p2511_p8  ;;  %p1766_p10 = por %p1765_p6, %p1764_p1 }
  0x70   : > { %p1760_p12 = pneg %p1759_p5 }
  0x72   : > { %p1767_p9 = pnand %p1766_p10, %p1760_p12 }
  0x74   : > { %1770 = shalt.err (!%p1767_p9)
}
  0x75   : > { %p2512_p4 = scmp.ne.s32.totalorder %s2500_s28, 0  ;;  %s2513_s10 = smov 4  }
  0x76   : > { %s2514_s15 = smov 64   ;;  %s1771_s12 = scalar_lea.hbm %s2460_s8, 16 }
  0x77   : > { %1590 = dma.hbm_to_vmem [thread:$0]  (!%p2512_p4), %s2459_s7, 256, %s344_s20, [#allocation10], %s2514_s15, %s2514_s15, %s2513_s10  }
  0x78   : > { %p1772_p11 = scmp.ne.s32.totalorder %s2460_s8, %s1771_s12  ;;  %p1778_p7 = scmp.lt.u32.totalorder %s1771_s12, %s2460_s8 }
  0x7a   : > { %p1774_p9 = pnand %p1772_p11, %p2511_p8 }
  0x7c   : > { %p1775_p13 = pneg %p1774_p9 }
  0x7e   : > { %p1780_p2 = pnand %p1778_p7, %p1775_p13 }
  0x80   : > { %1783 = shalt.err (!%p1780_p2)
}
  0x81   : > { %s1784_s4 = scalar_lea.vmem %s358_s1, 16  ;;  %s1791_s20 = scalar_lea.vmem %s358_s1, 32 }
  0x82   : > { %p1785_p3 = scmp.ne.s32.totalorder %s358_s1, %s1784_s4  ;;  %p1792_p1 = scmp.lt.s32.totalorder %s358_s1, %s358_s1 }
  0x83   : > { %p1793_p6 = scmp.lt.s32.totalorder %s1791_s20, %s1784_s4 }
  0x84   : > { %p1787_p5 = pnand %p1785_p3, %p2511_p8 }
  0x85   : > { %p1794_p10 = por %p1793_p6, %p1792_p1 }
  0x86   : > { %p1788_p12 = pneg %p1787_p5 }
  0x88   : > { %p1795_p0 = pnand %p1794_p10, %p1788_p12 }
  0x8a   : > { %1798 = shalt.err (!%p1795_p0)
}
  0x8b   : > { %1593 = dma.hbm_to_vmem [thread:$0]  (!%p2512_p4), %s2460_s8, 16, %s358_s1, [#allocation13]  }
  0x8c   : > { %s2217_s3 = scalar_lea.hbm %s2452_s0, %s2124_s29  ;;  %s378_s14 = scalar_lea.vmem [#allocation3], %s2128_s11 }
  0x8d   : > { %s385_s28 = sshll.u32 %s378_s14, 4  ;;  %s2226_s30 = scalar_lea.hbm %s2454_s2, %s2124_s29  ;;  %s2220_s28 = int_to_ptr.vmem [resolvable:$true] %s385_s28 }
  0x8e   : > { %s2515_s22 = sand.u32 1, %s1933_s19   ;;  %s1799_s17 = scalar_lea.hbm %s2217_s3, 64 }
  0x8f   : > { %s375_s1 = scalar_lea.sflag [#allocation4], %s2515_s22  ;;  %p1800_p0 = scmp.ne.s32.totalorder %s2217_s3, %s1799_s17 }
  0x90   : > { %p2516_p8 = scmp.ne.s32.totalorder %s2510_s16, 0  ;;  %s1804_s10 = scalar_lea.hbm %s2452_s0, 128 }
  0x91   : > { %p1805_p9 = scmp.lt.u32.totalorder %s2217_s3, %s2452_s0  ;;  %p1806_p13 = scmp.lt.u32.totalorder %s1804_s10, %s1799_s17 }
  0x92   : > { %p1802_p4 = pnand %p1800_p0, %p2516_p8  ;;  %p1808_p2 = scmp.lt.u32.totalorder %s1799_s17, %s2217_s3 }
  0x93   : > { %p1807_p7 = por %p1806_p13, %p1805_p9 }
  0x94   : > { %p1803_p11 = pneg %p1802_p4 }
  0x95   : > { %p1809_p3 = por %p1808_p2, %p1807_p7 }
  0x97   : > { %p1810_p5 = pnand %p1809_p3, %p1803_p11 }
  0x99   : > { %1813 = shalt.err (!%p1810_p5)
}
  0x9a   : > { %s1814_s29 = scalar_lea.vmem %s2220_s28, 64  ;;  %s1945_s9 = smov [#allocation3]  }
  0x9b   : > { %p1815_p12 = scmp.ne.s32.totalorder %s2220_s28, %s1814_s29  ;;  %s1819_s14 = sshll.u32 %s1945_s9, 4  ;;  %s1820_s14 = int_to_ptr.vmem [resolvable:$false] %s1819_s14 }
  0x9c   : > { %s1821_s12 = scalar_lea.vmem %s1820_s14, 128  ;;  %p1822_p10 = scmp.lt.s32.totalorder %s2220_s28, %s1820_s14 }
  0x9d   : > { %p1817_p1 = pnand %p1815_p12, %p2516_p8  ;;  %p1823_p0 = scmp.lt.s32.totalorder %s1821_s12, %s1814_s29 }
  0x9f   : > { %p1818_p6 = pneg %p1817_p1  ;;  %p1824_p4 = por %p1823_p0, %p1822_p10 }
  0xa1   : > { %p1825_p9 = pnand %p1824_p4, %p1818_p6 }
  0xa3   : > { %1828 = shalt.err (!%p1825_p9)
}
  0xa4   : > { %p2517_p11 = scmp.ne.s32.totalorder %s2508_s27, 0  ;;  %s414_s24 = scalar_lea.vmem [#allocation8], %s2128_s11 }
  0xa5   : > { %s421_s22 = sshll.u32 %s414_s24, 4  ;;  %s1829_s17 = scalar_lea.hbm %s2226_s30, 64  ;;  %s422_s22 = int_to_ptr.vmem [resolvable:$true] %s421_s22 }
  0xa6   : > { %1597 = dma.hbm_to_vmem [thread:$0]  (!%p2517_p11), %s2217_s3, 64, %s2220_s28, %s375_s1  }
  0xa7   : > { %p1830_p13 = scmp.ne.s32.totalorder %s2226_s30, %s1829_s17  ;;  %s1834_s10 = scalar_lea.hbm %s2454_s2, 128 }
  0xa8   : > { %p1835_p3 = scmp.lt.u32.totalorder %s2226_s30, %s2454_s2  ;;  %p1836_p5 = scmp.lt.u32.totalorder %s1834_s10, %s1829_s17 }
  0xa9   : > { %p1832_p7 = pnand %p1830_p13, %p2516_p8  ;;  %p1838_p1 = scmp.lt.u32.totalorder %s1829_s17, %s2226_s30 }
  0xaa   : > { %p1837_p12 = por %p1836_p5, %p1835_p3 }
  0xab   : > { %p1833_p2 = pneg %p1832_p7 }
  0xac   : > { %p1839_p6 = por %p1838_p1, %p1837_p12 }
  0xae   : > { %p1840_p10 = pnand %p1839_p6, %p1833_p2 }
  0xb0   : > { %1843 = shalt.err (!%p1840_p10)
}
  0xb1   : > { %s1844_s11 = scalar_lea.vmem %s422_s22, 64  ;;  %s1946_s3 = smov [#allocation8]  }
  0xb2   : > { %p1845_p0 = scmp.ne.s32.totalorder %s422_s22, %s1844_s11  ;;  %s1849_s28 = sshll.u32 %s1946_s3, 4  ;;  %s1850_s28 = int_to_ptr.vmem [resolvable:$false] %s1849_s28 }
  0xb3   : > { %s1851_s1 = scalar_lea.vmem %s1850_s28, 128  ;;  %p1852_p13 = scmp.lt.s32.totalorder %s422_s22, %s1850_s28 }
  0xb4   : > { %p1847_p4 = pnand %p1845_p0, %p2516_p8  ;;  %p1853_p7 = scmp.lt.s32.totalorder %s1851_s1, %s1844_s11 }
  0xb6   : > { %p1848_p9 = pneg %p1847_p4  ;;  %p1854_p11 = por %p1853_p7, %p1852_p13 }
  0xb8   : > { %p1855_p3 = pnand %p1854_p11, %p1848_p9 }
  0xba   : > { %1858 = shalt.err (!%p1855_p3)
}
  0xbb   : > { %p2518_p5 = scmp.ne.s32.totalorder %s2508_s27, 0  ;;  %p2519_p2 = scmp.ne.s32.totalorder %s2499_s25, 0 }
  0xbc   : > { %s2273_s16 = sand.u32 (!%p2519_p2), 1, %s1929_s18   ;;  %p2520_p8 = scmp.ne.s32.totalorder (!%p2519_p2), %s2496_s23, 0 }
  0xbd   : > { %1603 = dma.hbm_to_vmem [thread:$0]  (!%p2518_p5), %s2226_s30, 64, %s422_s22, %s2144_s13  }
  0xbe   : > { %430 = sbr.rel (%p2519_p2) target bundleno = 1668 (0x684), region = 64  ;;  %s2276_s29 = sshll.u32 (!%p2519_p2), %s2273_s16, 2 }
  0xbf   : > { %s433_s9 = scalar_lea.sflag (!%p2519_p2), [#allocation4], %s2273_s16  ;;  %s436_s14 = scalar_lea.vmem (!%p2519_p2), [#allocation3], %s2276_s29 }
  0xc5   : > { %1904 = dma.done.wait (%p2520_p8), %s433_s9, 64  }
  0xc6   : > { %1906 = vsyncadd (%p2520_p8), %s433_s9, 4294967232  ;;  %s441_s25 = sand.u32 1, %s2037_s21   ;;  %s445_s27 = scalar_lea.vmem [#allocation6], %s2276_s29 }
  0xc7   : > { %s442_s13 = scalar_lea.sflag [#allocation7], %s441_s25 }
  0xc8   : > { %1908 = dma.done.wait (%p2520_p8), %s442_s13, 128  }
  0xc9   : > { %1910 = vsyncadd (%p2520_p8), %s442_s13, 4294967168  ;;  %s454_s30 = scalar_lea.vmem [#allocation8], %s2276_s29  ;;  %p2521_p11 = scmp.eq.s32.totalorder %s2037_s21, 0 }
  0xcb   : > { %1912 = dma.done.wait (%p2521_p11), [#allocation10], 512   ;;  %p2522_p12 = pmov %p2521_p11 }
  0xcc   : > { %p2523_p1 = pmov %p2521_p11 }
  0xcd   : > { %1914 = vsyncadd (%p2522_p12), [#allocation10], 4294966784 }
  0xce   : > { %1916 = dma.done.wait (%p2523_p1), [#allocation13], 16   ;;  %p2524_p6 = pmov %p2523_p1 }
  0xcf   : > { %v1947_v0 = vmov 0.0   ;;  %vm1948_vm0 = vmmov 0   ;;  %v1661_v1 = vld [vmem:[%s2457_s5] sm:$0xff]   ;;  %v1663_v3 = vld [vmem:[%s2457_s5 + $0x8] sm:$0xff]   ;;  %vm540_vm1 = vcmask 261120   ;;  %s2525_s15 = sld [smem:[#allocation28_spill]] }
  0xd0   : > { %1918 = vsyncadd (%p2524_p6), [#allocation13], 4294967280  ;;  %1492 = vmatprep.subr.bf16.mxu1 %v1947_v0  ;;  %1484 = vmatprep.subr.bf16.mxu0 %v1947_v0  ;;  %v1662_v2 = vld [vmem:[#allocation9] sm:$0xff]   ;;  %v585_v4 = vld [vmem:[%s445_s27] sm:$0xf]  ;;  %vm721_vm2 = vcmask 64512  }
  0xd1   : > { %1496 = vmatprep.mubr.msk.bf16.mxu1 %vm1948_vm0, %v1947_v0  ;;  %1488 = vmatprep.mubr.msk.bf16.mxu0 %vm1948_vm0, %v1947_v0  ;;  %v1664_v5 = vld [vmem:[#allocation9 + $0x8] sm:$0xff]   ;;  %v1432_v7 = vld [vmem:[%s2458_s6] ss:$0 sm:$0xff]  ;;  %s1949_s26 = smov 112   ;;  %s1950_s11 = smov 120   ;;  %v1665_v22 = vld [vmem:[#allocation11] sm:$0xff]  }
  0xd2   : > { %1493 = vmatpush3.bf16.msra.mxu1 %v1661_v1  ;;  %1485 = vmatpush3.bf16.msra.mxu0 %v1662_v2  ;;  %v516_v6 = vld [vmem:[%s436_s14] sm:$0xf]  ;;  %s1951_s3 = smov 104   ;;  %v1666_v23 = vld [vmem:[#allocation11 + $0x8] sm:$0xff]   ;;  %v1436_v40 = vld [vmem:[#allocation12] ss:$0 sm:$0xff] }
  0xd3   : > { %1494 = vmatprep.subr.bf16.mxu1 %v1947_v0  ;;  %1486 = vmatprep.subr.bf16.mxu0 %v1947_v0  ;;  %v653_v24 = vld [vmem:[%s454_s30] sm:$0xf]  ;;  %vm784_vm3 = vcmask 1043456   ;;  %s1952_s28 = smov 8   ;;  %s2526_s9 = sld [smem:[#allocation29_spill]]  ;;  %vm947_vm4 = vcmask 130112  }
  0xd4   : > { %s1953_s13 = smov 16   ;;  %s1954_s27 = smov 24   ;;  %vm1064_vm5 = vcmask 195712   ;;  %vm1181_vm6 = vcmask 261312  }
  0xd5   : > { %v1428_v8 = vld [vmem:[%s2525_s15] ss:$0 sm:$0xff]  ;;  %s1427_s30 = sshll.u32 %s2273_s16, 3  ;;  %s2527_s24 = sld [smem:[#allocation30_spill]] }
  0xd6   : > { %1495 = vmatpush3.bf16.msra.mxu1 %v1663_v3  ;;  %1487 = vmatpush3.bf16.msra.mxu0 %v1664_v5  ;;  %s2528_s22 = sld [smem:[#allocation25_spill]]  ;;  %s1453_s17 = sshll.u32 %s2037_s21, 7 }
  0xd7   : > { %1508 = vmatprep.subr.bf16.mxu1 %v1947_v0  ;;  %1500 = vmatprep.subr.bf16.mxu0 %v1947_v0  ;;  %s514_s4 = scalar_lea.vmem [#allocation14], %s1427_s30  ;;  %s1253_s21 = scalar_lea.sflag [#allocation5], %s2273_s16 }
  0xd8   : > { %s1266_s20 = sshll.u32 %s514_s4, 4  ;;  %s2409_s20 = int_to_ptr.vmem [resolvable:$true] %s1266_s20 }
  0xd9   : > { %1497 = vmatmul.mubr.msk.bf16.vlgmr.msra.gmra.mrb[0].mxu1 %vm540_vm1, %v585_v4  ;;  %1489 = vmatmul.mubr.msk.bf16.vlgmr.msra.gmra.mrb[0].mxu0 %vm540_vm1, %v516_v6 }
  0xda   : > { %1510 = vmatprep.mubr.msk.bf16.mxu1 %vm1948_vm0, %v1947_v0  ;;  %1504 = vmatprep.mubr.msk.bf16.mxu0 %vm1948_vm0, %v1947_v0 }
  0xdb   : > { %1501 = vmatpush3.bf16.msra.mxu0 %v1665_v22 }
  0xdc   : > { %1502 = vmatprep.subr.bf16.mxu0 %v1947_v0  ;;  %p2530_p0 = scmp.ne.s32.totalorder %s2528_s22, 0 }
  0xdf   : > { %1503 = vmatpush3.bf16.msra.mxu0 %v1666_v23 }
  0xe0   : > { %1514 = vmatprep.subr.bf16.mxu0 %v1947_v0 }
  0xe2   : > { %1505 = vmatmul.mubr.msk.bf16.vlgmr.msra.gmra.mrb[4].mxu0 %vm540_vm1, %v653_v24 }
  0xe3   : > { %1516 = vmatprep.mubr.msk.bf16.mxu0 %vm1948_vm0, %v1947_v0 }
 0x1ac   : > { %v646_v9 = vpop.f32.mrb[0].mxu1  ;;  %v578_v12 = vpop.f32.mrb[0].mxu0 }
 0x1ad   : > { %v647_v10 = vadd.f32 %v1432_v7, %v646_v9  ;;  %v1498_v11 = vpop.f32.mrb[1].mxu1  ;;  %v579_v14 = vadd.f32 %v1428_v8, %v578_v12  ;;  %v1490_v15 = vpop.f32.mrb[1].mxu0 }
 0x1ae   : > { %v649_v13 = vpop.f32.mrb[2].mxu1  ;;  %v581_v18 = vpop.f32.mrb[2].mxu0 }
 0x1af   : > { %v652_v16 = vpack.c.bf16 %v647_v10, %v647_v10  ;;  %v1499_v17 = vpop.f32.mrb[3].mxu1  ;;  %v1491_v19 = vpop.f32.mrb[3].mxu0  ;;  %v584_v20 = vpack.c.bf16 %v579_v14, %v579_v14 }
 0x1b1   : > { %951 = vrot.lane.b32.xlu1 %v652_v16, %s1949_s26  ;;  %833 = vrot.lane.b32.xlu0 %v652_v16, %s1950_s11  ;;  %v726_v21 = vsel %vm721_vm2, %v652_v16, 0 }
 0x1b2   : > { %1509 = vmatpush3.bf16.xpose.msra.mxu1 %v726_v21 }
 0x1b3   : > { %1520 = vmatprep.subr.bf16.mxu1 %v1947_v0 }
 0x1b5   : > { %949 = vrot.lane.b32.xlu1 %v584_v20, %s1949_s26  ;;  %830 = vrot.lane.b32.xlu0 %v584_v20, %s1950_s11  ;;  %v714_v41 = vpop.f32.mrb[4].mxu0 }
 0x1b6   : > { %v715_v42 = vadd.f32 %v1436_v40, %v714_v41  ;;  %v1506_v43 = vpop.f32.mrb[5].mxu0 }
 0x1b7   : > { %v717_v44 = vpop.f32.mrb[6].mxu0 }
 0x1b8   : > { %v720_v45 = vpack.c.bf16 %v715_v42, %v715_v42  ;;  %v1507_v46 = vpop.f32.mrb[7].mxu0 }
 0x1b9   : > { %1066 = vrot.lane.b32.xlu1 %v584_v20, %s1951_s3  ;;  %1068 = vrot.lane.b32.xlu0 %v652_v16, %s1951_s3 }
 0x1ba   : > { %1511 = vmatmul.mubr.msk.bf16.vlgmr.msra.gmra.mrb[4].mxu1 %vm721_vm2, %v584_v20  ;;  %v786_v47 = vsel %vm784_vm3, %v720_v45, 0 }
 0x1bb   : > { %1522 = vmatprep.mubr.msk.bf16.mxu1 %vm1948_vm0, %v1947_v0  ;;  %1515 = vmatpush3.bf16.msra.mxu0 %v786_v47 }
 0x1bc   : > { %1526 = vmatprep.subr.bf16.mxu0 %v1947_v0 }
 0x223   : > { %v834_v25 = vpop.permute.xlu0 %833  ;;  %v952_v27 = vpop.permute.xlu1 %951 }
 0x224   : > { %v839_v26 = vsel %vm721_vm2, %v834_v25, 0  ;;  %v957_v29 = vsel %vm721_vm2, %v952_v27, 0 }
 0x225   : > { %1521 = vmatpush3.bf16.xpose.msra.mxu1 %v839_v26 }
 0x226   : > { %1532 = vmatprep.subr.bf16.mxu1 %v1947_v0 }
 0x227   : > { %v831_v28 = vpop.permute.xlu0 %830  ;;  %v950_v31 = vpop.permute.xlu1 %949 }
 0x22b   : > { %v1069_v30 = vpop.permute.xlu0 %1068  ;;  %v1067_v33 = vpop.permute.xlu1 %1066 }
 0x22c   : > { %1523 = vmatmul.mubr.msk.bf16.vlgmr.msra.gmra.mrb[8].mxu1 %vm721_vm2, %v831_v28  ;;  %v1074_v32 = vsel %vm721_vm2, %v1069_v30, 0 }
 0x22d   : > { %1533 = vmatpush3.bf16.xpose.msra.mxu1 %v957_v29  ;;  %1534 = vmatprep.mubr.msk.bf16.mxu1 %vm1948_vm0, %v1947_v0 }
 0x22e   : > { %1544 = vmatprep.subr.bf16.mxu1 %v1947_v0 }
 0x234   : > { %1535 = vmatmul.mubr.msk.bf16.vlgmr.msra.gmra.mrb[12].mxu1 %vm721_vm2, %v950_v31 }
 0x235   : > { %1545 = vmatpush3.bf16.xpose.msra.mxu1 %v1074_v32  ;;  %1546 = vmatprep.mubr.msk.bf16.mxu1 %vm1948_vm0, %v1947_v0 }
 0x236   : > { %1556 = vmatprep.subr.bf16.mxu1 %v1947_v0 }
 0x23c   : > { %1547 = vmatmul.mubr.msk.bf16.vlgmr.msra.gmra.mrb[16].mxu1 %vm721_vm2, %v1067_v33 }
 0x23d   : > { %1560 = vmatprep.mubr.msk.bf16.mxu1 %vm1948_vm0, %v1947_v0 }
 0x28d   : > { %v762_v34 = vpop.f32.mrb[4].mxu1 }
 0x28e   : > { %v768_v35 = vmul.f32 0.35355338, %v762_v34  ;;  %v1512_v36 = vpop.f32.mrb[5].mxu1 }
 0x28f   : > { %v765_v37 = vpop.f32.mrb[6].mxu1 }
 0x290   : > { %v1513_v38 = vpop.f32.mrb[7].mxu1  ;;  %v769_v39 = vsel %vm721_vm2, %v768_v35, -inf }
 0x291   : > { %770 = vmax.xlane.f32.xlu0 %v769_v39 }
 0x2ff   : > { %v875_v48 = vpop.f32.mrb[8].mxu1 }
 0x300   : > { %v881_v49 = vmul.f32 0.35355338, %v875_v48  ;;  %v1524_v50 = vpop.f32.mrb[9].mxu1 }
 0x301   : > { %v878_v51 = vpop.f32.mrb[10].mxu1 }
 0x302   : > { %v1525_v52 = vpop.f32.mrb[11].mxu1  ;;  %v882_v53 = vsel %vm721_vm2, %v881_v49, -inf }
 0x303   : > { %883 = vmax.xlane.f32.xlu1 %v882_v53  ;;  %v1667_v53 = vld [vmem:[%s2526_s9] sm:$0xff]  }
 0x304   : > { %1557 = vmatpush3.bf16.msra.mxu1 %v1667_v53 }
 0x305   : > { %1558 = vmatprep.subr.bf16.mxu1 %v1947_v0 }
 0x307   : > { %v993_v54 = vpop.f32.mrb[12].mxu1 }
 0x308   : > { %v999_v55 = vmul.f32 0.35355338, %v993_v54  ;;  %v1536_v56 = vpop.f32.mrb[13].mxu1  ;;  %v1668_v54 = vld [vmem:[%s2526_s9 + $0x8] sm:$0xff]  }
 0x309   : > { %v996_v57 = vpop.f32.mrb[14].mxu1  ;;  %1559 = vmatpush3.bf16.msra.mxu1 %v1668_v54 }
 0x30a   : > { %v1537_v58 = vpop.f32.mrb[15].mxu1  ;;  %v1000_v59 = vsel %vm721_vm2, %v999_v55, -inf }
 0x30b   : > { %1001 = vmax.xlane.f32.xlu0 %v1000_v59 }
 0x30f   : > { %v1110_v60 = vpop.f32.mrb[16].mxu1 }
 0x310   : > { %v1116_v61 = vmul.f32 0.35355338, %v1110_v60  ;;  %v1548_v62 = vpop.f32.mrb[17].mxu1 }
 0x311   : > { %v1113_v63 = vpop.f32.mrb[18].mxu1 }
 0x312   : > { %v1549_v1 = vpop.f32.mrb[19].mxu1  ;;  %v1117_v2 = vsel %vm721_vm2, %v1116_v61, -inf }
 0x313   : > { %1118 = vmax.xlane.f32.xlu0 %v1117_v2 }
 0x31e   : > { %v771_v3 = vpop.xlane.xlu0 %770 }
 0x31f   : > { %v772_v4 = vsub.f32 %v768_v35, %v771_v3 }
 0x321   : > { %v773_v5 = vmul.f32 1.442695, %v772_v4  ;;  %v1448_v4 = vld [vmem:[%s2527_s24] ss:$0 sm:$0xff] }
 0x323   : > { %1669 = vpow2.f32 %v773_v5 }
 0x32d   : > { %v1670_v6 = vpop.eup %1669 }
 0x32e   : > { %v775_v7 = vsel %vm721_vm2, %v1670_v6, 0.0 }
 0x32f   : > { %776 = vadd.xlane.f32.xlu1 %v775_v7 }
 0x340   : > { %895 = vrot.lane.b32.xlu1 %v720_v45, %s1950_s11 }
 0x390   : > { %v884_v8 = vpop.xlane.xlu1 %883 }
 0x391   : > { %v885_v9 = vsub.f32 %v881_v49, %v884_v8 }
 0x393   : > { %v886_v10 = vmul.f32 1.442695, %v885_v9 }
 0x395   : > { %1671 = vpow2.f32 %v886_v10 }
 0x398   : > { %v1002_v11 = vpop.xlane.xlu0 %1001 }
 0x399   : > { %v1003_v12 = vsub.f32 %v999_v55, %v1002_v11 }
 0x39b   : > { %v1004_v13 = vmul.f32 1.442695, %v1003_v12 }
 0x39d   : > { %1673 = vpow2.f32 %v1004_v13 }
 0x39f   : > { %v1672_v14 = vpop.eup %1671 }
 0x3a0   : > { %v1119_v15 = vpop.xlane.xlu0 %1118  ;;  %v888_v16 = vsel %vm721_vm2, %v1672_v14, 0.0 }
 0x3a1   : > { %v1120_v17 = vsub.f32 %v1116_v61, %v1119_v15  ;;  %889 = vadd.xlane.f32.xlu0 %v888_v16 }
 0x3a3   : > { %v1121_v18 = vmul.f32 1.442695, %v1120_v17 }
 0x3a5   : > { %1675 = vpow2.f32 %v1121_v18 }
 0x3a7   : > { %v1674_v19 = vpop.eup %1673 }
 0x3a8   : > { %v1006_v20 = vsel %vm721_vm2, %v1674_v19, 0.0 }
 0x3a9   : > { %1007 = vadd.xlane.f32.xlu1 %v1006_v20 }
 0x3af   : > { %v1676_v21 = vpop.eup %1675 }
 0x3b0   : > { %v1123_v22 = vsel %vm721_vm2, %v1676_v21, 0.0 }
 0x3b1   : > { %1124 = vadd.xlane.f32.xlu0 %v1123_v22 }
 0x3ba   : > { %1129 = vrot.lane.b32.xlu1 %v720_v45, %s1951_s3  ;;  %s1859_s3 = scalar_lea.vmem %s2409_s20, 128 }
 0x3bb   : > { %p1860_p10 = scmp.ne.s32.totalorder %s2409_s20, %s1859_s3 }
 0x3bc   : > { %v777_v23 = vpop.xlane.xlu1 %776 }
 0x3bd   : > { %1677 = vrcp.f32 %v777_v23  ;;  %p1861_p4 = pnand %p1860_p10, %p2530_p0 }
 0x3bf   : > { %p1862_p9 = pneg %p1861_p4 }
 0x3c0   : > { %v896_v25 = vpop.permute.xlu1 %895 }
 0x3c1   : > { %v901_v28 = vsel %vm784_vm3, %v896_v25, 0 }
 0x3c7   : > { %v1678_v24 = vpop.eup %1677  ;;  %1012 = vrot.lane.b32.xlu0 %v720_v45, %s1949_s26  ;;  %s2529_s26 = sld [smem:[#allocation31_spill]] }
 0x3c8   : > { %v779_v26 = vmul.f32 %v1678_v24, %v1670_v6 }
 0x3ca   : > { %v780_v27 = vpack.c.bf16 %v779_v26, %v779_v26 }
 0x3cc   : > { %1517 = vmatmul.mubr.msk.bf16.vlgmr.msra.gmra.mrb[8].mxu0 %vm721_vm2, %v780_v27 }
 0x3cd   : > { %1527 = vmatpush3.bf16.msra.mxu0 %v901_v28  ;;  %1528 = vmatprep.mubr.msk.bf16.mxu0 %vm1948_vm0, %v1947_v0  ;;  %s2407_s11 = scalar_lea.hbm %s2529_s26, %s1453_s17 }
 0x3ce   : > { %1538 = vmatprep.subr.bf16.mxu0 %v1947_v0 }
 0x42e   : > { %v890_v29 = vpop.xlane.xlu0 %889 }
 0x42f   : > { %1679 = vrcp.f32 %v890_v29 }
 0x436   : > { %v1008_v30 = vpop.xlane.xlu1 %1007 }
 0x437   : > { %1681 = vrcp.f32 %v1008_v30 }
 0x439   : > { %v1680_v31 = vpop.eup %1679 }
 0x43a   : > { %v892_v32 = vmul.f32 %v1680_v31, %v1672_v14  ;;  %v1130_v39 = vpop.permute.xlu1 %1129 }
 0x43b   : > { %v1135_v41 = vsel %vm784_vm3, %v1130_v39, 0 }
 0x43c   : > { %v893_v33 = vpack.c.bf16 %v892_v32, %v892_v32 }
 0x43e   : > { %v1125_v34 = vpop.xlane.xlu0 %1124  ;;  %1529 = vmatmul.mubr.msk.bf16.vlgmr.msra.gmra.mrb[12].mxu0 %vm721_vm2, %v893_v33 }
 0x43f   : > { %1683 = vrcp.f32 %v1125_v34  ;;  %1540 = vmatprep.mubr.msk.bf16.mxu0 %vm1948_vm0, %v1947_v0 }
 0x441   : > { %v1682_v35 = vpop.eup %1681 }
 0x442   : > { %v1010_v36 = vmul.f32 %v1682_v35, %v1674_v19  ;;  %v1013_v37 = vpop.permute.xlu0 %1012 }
 0x443   : > { %v1018_v38 = vsel %vm784_vm3, %v1013_v37, 0 }
 0x444   : > { %1539 = vmatpush3.bf16.msra.mxu0 %v1018_v38  ;;  %v1011_v40 = vpack.c.bf16 %v1010_v36, %v1010_v36 }
 0x445   : > { %1550 = vmatprep.subr.bf16.mxu0 %v1947_v0 }
 0x447   : > { %1541 = vmatmul.mubr.msk.bf16.vlgmr.msra.gmra.mrb[16].mxu0 %vm721_vm2, %v1011_v40 }
 0x448   : > { %1551 = vmatpush3.bf16.msra.mxu0 %v1135_v41  ;;  %1552 = vmatprep.mubr.msk.bf16.mxu0 %vm1948_vm0, %v1947_v0 }
 0x449   : > { %v1684_v42 = vpop.eup %1683 }
 0x44a   : > { %v1127_v43 = vmul.f32 %v1684_v42, %v1676_v21 }
 0x44c   : > { %v1128_v44 = vpack.c.bf16 %v1127_v43, %v1127_v43 }
 0x44f   : > { %1553 = vmatmul.mubr.msk.bf16.vlgmr.msra.gmra.mrb[20].mxu0 %vm721_vm2, %v1128_v44 }
 0x49f   : > { %v822_v45 = vpop.f32.mrb[8].mxu0 }
 0x4a0   : > { %828 = vst.msk [vmem:[#allocation2] sm:$0xff] %vm721_vm2, %v822_v45  ;;  %v1518_v46 = vpop.f32.mrb[9].mxu0 }
 0x4a1   : > { %v825_v47 = vpop.f32.mrb[10].mxu0 }
 0x4a2   : > { %v1519_v48 = vpop.f32.mrb[11].mxu0 }
 0x511   : > { %v937_v49 = vpop.f32.mrb[12].mxu0 }
 0x512   : > { %944 = vrot.lane.b32.xlu1 %v937_v49, %s1952_s28  ;;  %v1530_v50 = vpop.f32.mrb[13].mxu0  ;;  %s1955_s28 = smov [#allocation14]  }
 0x513   : > { %v940_v51 = vpop.f32.mrb[14].mxu0  ;;  %s1863_s1 = sshll.u32 %s1955_s28, 4  ;;  %s1864_s1 = int_to_ptr.vmem [resolvable:$false] %s1863_s1 }
 0x514   : > { %v1531_v52 = vpop.f32.mrb[15].mxu0  ;;  %s1865_s29 = scalar_lea.vmem %s1864_s1, 256  ;;  %p1866_p13 = scmp.lt.s32.totalorder %s2409_s20, %s1864_s1 }
 0x515   : > { %p1867_p7 = scmp.lt.s32.totalorder %s1865_s29, %s1859_s3 }
 0x517   : > { %p1868_p3 = por %p1867_p7, %p1866_p13 }
 0x519   : > { %p1869_p5 = pnand %p1868_p3, %p1862_p9 }
 0x51a   : > { %v1054_v55 = vpop.f32.mrb[16].mxu0 }
 0x51b   : > { %1061 = vrot.lane.b32.xlu0 %v1054_v55, %s1953_s13  ;;  %v1542_v56 = vpop.f32.mrb[17].mxu0 }
 0x51c   : > { %v1057_v57 = vpop.f32.mrb[18].mxu0 }
 0x51d   : > { %v1543_v58 = vpop.f32.mrb[19].mxu0 }
 0x522   : > { %v1171_v59 = vpop.f32.mrb[20].mxu0 }
 0x523   : > { %1178 = vrot.lane.b32.xlu1 %v1171_v59, %s1954_s27  ;;  %v1554_v60 = vpop.f32.mrb[21].mxu0 }
 0x524   : > { %v1174_v61 = vpop.f32.mrb[22].mxu0 }
 0x525   : > { %v1555_v62 = vpop.f32.mrb[23].mxu0 }
 0x584   : > { %v945_v63 = vpop.permute.xlu1 %944 }
 0x585   : > { %948 = vst.msk [vmem:[#allocation2] sm:$0xff] %vm947_vm4, %v945_v63 }
 0x58d   : > { %v1062_v0 = vpop.permute.xlu0 %1061 }
 0x58e   : > { %1065 = vst.msk [vmem:[#allocation2] sm:$0xff] %vm1064_vm5, %v1062_v0 }
 0x595   : > { %v1179_v1 = vpop.permute.xlu1 %1178 }
 0x596   : > { %1182 = vst.msk [vmem:[#allocation2] sm:$0xff] %vm1181_vm6, %v1179_v1 }
 0x59d   : > { %v1183_v2 = vld [vmem:[#allocation2] sm:$0xff] }
 0x59e   : > { %v1184_v3 = vpack.c.bf16 %v1183_v2, %v1183_v2 }
 0x5a0   : > { %1561 = vmatmul.mubr.msk.bf16.vlgmr.msra.gmra.mrb[20].mxu1 %vm540_vm1, %v1184_v3 }
 0x673   : > { %v1245_v5 = vpop.f32.mrb[20].mxu1 }
 0x674   : > { %v1246_v6 = vadd.f32 %v1448_v4, %v1245_v5  ;;  %v1562_v7 = vpop.f32.mrb[21].mxu1 }
 0x675   : > { %v1248_v8 = vpop.f32.mrb[22].mxu1 }
 0x676   : > { %v1563_v9 = vpop.f32.mrb[23].mxu1  ;;  %1251 = vst.msk [vmem:[%s514_s4] sm:$0xff] %vm540_vm1, %v1246_v6 }
 0x677   : > { %1872 = shalt.err (!%p1869_p5)
}
 0x678   : > { %s1873_s16 = scalar_lea.hbm %s2407_s11, 128  ;;  %s1877_s13 = scalar_lea.hbm %s2529_s26, 256 }
 0x679   : > { %p1874_p2 = scmp.ne.s32.totalorder %s2407_s11, %s1873_s16  ;;  %p1878_p12 = scmp.lt.u32.totalorder %s2407_s11, %s2529_s26 }
 0x67a   : > { %p1879_p1 = scmp.lt.u32.totalorder %s1877_s13, %s1873_s16  ;;  %p1881_p10 = scmp.lt.u32.totalorder %s1873_s16, %s2407_s11 }
 0x67b   : > { %p1875_p8 = pnand %p1874_p2, %p2530_p0 }
 0x67c   : > { %p1880_p6 = por %p1879_p1, %p1878_p12 }
 0x67d   : > { %p1876_p11 = pneg %p1875_p8 }
 0x67e   : > { %p1882_p4 = por %p1881_p10, %p1880_p6 }
 0x680   : > { %p1883_p9 = pnand %p1882_p4, %p1876_p11 }
 0x682   : > { %1886 = shalt.err (!%p1883_p9)
}
 0x683   : > { %1582 = dma.vmem_to_hbm [thread:$0]  (%p2530_p0), %s2409_s20, 128, %s2407_s11, %s1253_s21  }
 0x684 PF: > { %s2531_s23 = sld [smem:[#allocation20_spill]]  ;;  %s2532_s12 = sld [smem:[#allocation22_spill]] }
 0x685   : > { %s2533_s24 = sld [smem:[#allocation21_spill]] }
 0x68a   : > { %s1278_s17 = sand.u32 1, %s2531_s23   ;;  %p2534_p13 = scmp.ne.s32.totalorder %s2532_s12, 0 }
 0x68b   : > { %p2535_p7 = scmp.ge.s32.totalorder %s2533_s24, 2  ;;  %s1279_s4 = scalar_lea.sflag [#allocation5], %s1278_s17 }
 0x68d   : > { %p1605_p3 = pnand %p2535_p7, %p2534_p13 }
 0x68f   : > { %1920 = dma.done.wait (!%p1605_p3), %s1279_s4, 128  }
 0x690   : > { %1922 = vsyncadd (!%p1605_p3), %s1279_s4, 4294967168  ;;  %s2536_s20 = sld [smem:[#allocation23_spill]]  ;;  %s2537_s10 = sld [smem:[#allocation24_spill]] }
 0x691   : > { %s2538_s17 = smov %s1929_s18  ;;  %s2539_s18 = smov %s1933_s19 }
 0x696   : > { %p29_p5 = scmp.ge.s32.totalorder %s2536_s20, 4   ;;  %s2540_s19 = smov %s2537_s10 }
 0x698   :  { %31 = sbr.rel (!%p29_p5) target bundleno = 16 (0x10), region = 145 }
 0x69f   :  { %1284 = vsyncpa [#allocation4], 1 }
 0x6a0   :  { %1286 = vsyncpa [#allocation4 + $0x1], 1 }
 0x6a1   :  { %1287 = vsyncpa [#allocation7], 1 }
 0x6a2   :  { %1289 = vsyncpa [#allocation7 + $0x1], 1 }
 0x6a3   :  { %1290 = vsyncpa [#allocation10], 1 }
 0x6a4   :  { %1291 = vsyncpa [#allocation13], 1 }
 0x6a5   :  { %1292 = vsyncpa [#allocation5], 1 }
 0x6a6   :  { %1294 = vsyncpa [#allocation5 + $0x1], 1 }

</bundles_post_ra>
